<compile_context>
chip_gen: v7x
topology: tpu7x:2x2x1
jax: 0.10.0
libtpu: 0.0.40
codegen_flags: <defaults>
</compile_context>

<pallas_src>
import math

import jax
import jax.numpy as jnp
from jax.experimental import pallas as pl
from jax.experimental.pallas import tpu as pltpu

# Synthetic "dataset" size for the autoencoder (stands in for nb_movies).
NB_MOVIES = 256
H1 = 20
H2 = 10


def sae_kernel(x_ref, w1_ref, w2_ref, w3_ref, w4_ref, b_ref, o_ref):
    """Full SAE forward for one batch tile, entirely in VMEM.

    x: (tb, nb_movies); weights resident across the batch grid.
    All matmuls: bf16 x bf16 operands -> f32 accumulation (single-pass MXU).
    Bias + sigmoid epilogue in f32 (safe on v5e, whose VPU/EUP lack bf16).
    """
    mxu = jnp.bfloat16
    acc = jnp.float32

    def sigmoid(v):
        # 0.5*(tanh(0.5 v) + 1): mathematically identical to 1/(1+e^-v) but the
        # transcendental stays on the EUP slot (no VALU reciprocal/divide).
        return 0.5 * jnp.tanh(0.5 * v) + 0.5

    # Packed biases: row 0..2 hold b1/b2/b3 in their leading lanes, row 3 = b4.
    b1 = b_ref[0:1, :H1].astype(acc)
    b2 = b_ref[1:2, :H2].astype(acc)
    b3 = b_ref[2:3, :H1].astype(acc)
    b4 = b_ref[3:4, :].astype(acc)

    x = x_ref[...].astype(mxu)
    h = jnp.dot(x, w1_ref[...].astype(mxu), preferred_element_type=acc)
    h = sigmoid(h + b1)

    h = jnp.dot(h.astype(mxu), w2_ref[...].astype(mxu), preferred_element_type=acc)
    h = sigmoid(h + b2)

    h = jnp.dot(h.astype(mxu), w3_ref[...].astype(mxu), preferred_element_type=acc)
    h = sigmoid(h + b3)

    out = jnp.dot(h.astype(mxu), w4_ref[...].astype(mxu), preferred_element_type=acc)
    o_ref[...] = (out + b4).astype(o_ref.dtype)


def _choose_tb(batch, sublane, cap=256):
    """Sublane-multiple batch tile: minimal padding, >=4 grid steps, <=cap rows.

    Roofline saturates well before 256-row tiles at these layer widths; >=4
    grid steps give v7x's two TensorCores >=2 pipelined steps each.
    """
    if batch <= sublane:
        return sublane
    best, best_key = sublane, None
    for tb in range(sublane, min(cap, batch) + 1, sublane):
        steps = pl.cdiv(batch, tb)
        waste = steps * tb - batch          # padded rows in the last block
        key = (max(0, 4 - steps), waste, -tb)
        if best_key is None or key < best_key:
            best, best_key = tb, key
    return best


def _pack_biases(b1, b2, b3, b4, d, dtype):
    rows = []
    for b in (b1, b2, b3):
        b = b.reshape(1, -1)
        rows.append(jnp.pad(b, ((0, 0), (0, d - b.shape[-1]))))
    rows.append(b4.reshape(1, -1))
    return jnp.concatenate(rows, axis=0).astype(dtype)


def sae_forward(x, params, *, tb=None):
    """Tiles the batch dimension; weights + packed biases stay VMEM-resident."""
    B, D = x.shape
    assert D == NB_MOVIES
    w1, b1, w2, b2, w3, b3, w4, b4 = params
    b_packed = _pack_biases(b1, b2, b3, b4, D, w1.dtype)

    dtype = x.dtype
    dbytes = jnp.dtype(dtype).itemsize
    sublane = 16 if dtype == jnp.bfloat16 else 8
    if tb is None:
        tb = _choose_tb(B, sublane)
    assert tb % sublane == 0, "batch tile must respect sublane packing"

    weights = (w1, w2, w3, w4, b_packed)
    weight_bytes = sum(math.prod(p.shape) * p.dtype.itemsize for p in weights)

    flops = 2 * B * (D * H1 + H1 * H2 + H2 * H1 + H1 * D)
    cost = pl.CostEstimate(
        flops=flops,
        transcendentals=B * (H1 + H2 + H1),           # tanh-based sigmoids
        bytes_accessed=2 * B * D * dbytes + weight_bytes)

    # VMEM budget: double-buffered x/out tiles + (double-buffered) resident
    # weights + lane-padded f32 intermediates, plus modest headroom for
    # compiler internal scratch.  No artificial floor/clamp (v7x has 64 MiB).
    vmem_need = (2 * 2 * tb * D * dbytes      # pipelined x + out tiles
                 + 2 * weight_bytes           # weights/biases (2 buffers each)
                 + 10 * tb * 128 * 4          # hidden activations, lane-padded
                 + tb * D * 4)                # f32 fc4 accumulator tile
    vmem_limit = int(vmem_need + (12 << 20))

    # No host-side pad/slice: Pallas masks the partial last block if B % tb.
    grid = (pl.cdiv(B, tb),)

    def full_spec(arr):
        # Whole-array block, same block index every grid step -> stays resident
        # in VMEM across the batch loop.
        return pl.BlockSpec(arr.shape, lambda i: (0,) * arr.ndim)

    # NOTE(v7x): pltpu.CORE_PARALLEL on the batch axis may shard the two
    # TensorCores more reliably than "parallel"; kept portable here.
    return pl.pallas_call(
        sae_kernel,
        out_shape=jax.ShapeDtypeStruct((B, D), dtype),
        grid_spec=pltpu.PrefetchScalarGridSpec(
            num_scalar_prefetch=0,
            grid=grid,
            in_specs=[
                pl.BlockSpec((tb, D), lambda i: (i, 0)),   # x, tiled on batch
                full_spec(w1), full_spec(w2),
                full_spec(w3), full_spec(w4),
                full_spec(b_packed),
            ],
            out_specs=pl.BlockSpec((tb, D), lambda i: (i, 0)),
        ),
        compiler_params=pltpu.CompilerParams(
            dimension_semantics=("parallel",),
            vmem_limit_bytes=vmem_limit),
        cost_estimate=cost,
    )(x, w1, w2, w3, w4, b_packed)


def init_params(key, dtype=jnp.float32):
    """Deterministic init mimicking nn.Linear's U(-1/sqrt(fan_in), 1/sqrt(fan_in))."""
    dims = [(NB_MOVIES, H1), (H1, H2), (H2, H1), (H1, NB_MOVIES)]
    params = []
    for fan_in, fan_out in dims:
        key, kw, kb = jax.random.split(key, 3)
        bound = 1.0 / (fan_in ** 0.5)
        w = jax.random.uniform(kw, (fan_in, fan_out), jnp.float32, -bound, bound)
        b = jax.random.uniform(kb, (1, fan_out), jnp.float32, -bound, bound)
        params.extend([w.astype(dtype), b.astype(dtype)])
    return tuple(params)


def sae_reference(x, params):
    """Pure-JAX reference computed in f32 from the (possibly bf16) params."""
    w1, b1, w2, b2, w3, b3, w4, b4 = [p.astype(jnp.float32) for p in params]
    x = x.astype(jnp.float32)
    h = jax.nn.sigmoid(x @ w1 + b1)
    h = jax.nn.sigmoid(h @ w2 + b2)
    h = jax.nn.sigmoid(h @ w3 + b3)
    return h @ w4 + b4


if __name__ == "__main__":
    key = jax.random.PRNGKey(0)
    key, kx = jax.random.split(key)

    # Demo batch gives 4 even grid steps at tb=128 (v7x: 2 TCs x 2 pipelined
    # steps each), no partial last block, bf16 I/O for the two big streams.
    batch = 512
    dtype = jnp.bfloat16

    # Synthetic ratings-style input in [0, 5].
    x = jax.random.uniform(kx, (batch, NB_MOVIES), jnp.float32, 0.0, 5.0)
    x = x.astype(dtype)
    params = init_params(key, dtype=dtype)

    out = jax.block_until_ready(sae_forward(x, params))
    ref = sae_reference(x, params)

    assert out.shape == (batch, NB_MOVIES)
    assert out.dtype == dtype
    out_f32 = out.astype(jnp.float32)
    max_err = float(jnp.max(jnp.abs(out_f32 - ref)))
    # Tolerance covers bf16 output rounding + bf16 inter-layer activation casts
    # (the reference keeps everything in f32 from the bf16 params).
    assert jnp.allclose(out_f32, ref, atol=5e-2, rtol=5e-2), (
        f"mismatch vs JAX reference, max abs err {max_err}")

    print("KERNEL_OK")
</pallas_src>

<mosaic_0001>
module attributes {stable_mosaic.version = 11 : i64} {
  func.func @sae_kernel(%arg0: i32, %arg1: memref<128x256xbf16, #tpu.memory_space<vmem>>, %arg2: memref<256x20xbf16, #tpu.memory_space<vmem>>, %arg3: memref<20x10xbf16, #tpu.memory_space<vmem>>, %arg4: memref<10x20xbf16, #tpu.memory_space<vmem>>, %arg5: memref<20x256xbf16, #tpu.memory_space<vmem>>, %arg6: memref<4x256xbf16, #tpu.memory_space<vmem>>, %arg7: memref<128x256xbf16, #tpu.memory_space<vmem>>) attributes {dimension_semantics = [#tpu.dimension_semantics<parallel>], iteration_bounds = array<i64: 4>, scalar_prefetch = 0 : i64, scratch_operands = 0 : i64, tpu.core_type = #tpu.core_type<tc>, window_params = [{transform_indices = @transform_0, window_bounds = array<i64: 128, 256>}, {pipeline_mode = #tpu.pipeline_mode<synchronous>, transform_indices = @transform_1, window_bounds = array<i64: 256, 20>}, {pipeline_mode = #tpu.pipeline_mode<synchronous>, transform_indices = @transform_2, window_bounds = array<i64: 20, 10>}, {pipeline_mode = #tpu.pipeline_mode<synchronous>, transform_indices = @transform_3, window_bounds = array<i64: 10, 20>}, {pipeline_mode = #tpu.pipeline_mode<synchronous>, transform_indices = @transform_4, window_bounds = array<i64: 20, 256>}, {pipeline_mode = #tpu.pipeline_mode<synchronous>, transform_indices = @transform_5, window_bounds = array<i64: 4, 256>}, {transform_indices = @transform_6, window_bounds = array<i64: 128, 256>}]} {
    %c0 = arith.constant 0 : index
    %c0_0 = arith.constant 0 : index
    %0 = vector.load %arg6[%c0, %c0_0] : memref<4x256xbf16, #tpu.memory_space<vmem>>, vector<1x20xbf16>
    %1 = arith.extf %0 : vector<1x20xbf16> to vector<1x20xf32>
    %c1 = arith.constant 1 : index
    %c0_1 = arith.constant 0 : index
    %2 = vector.load %arg6[%c1, %c0_1] : memref<4x256xbf16, #tpu.memory_space<vmem>>, vector<1x10xbf16>
    %3 = arith.extf %2 : vector<1x10xbf16> to vector<1x10xf32>
    %c2 = arith.constant 2 : index
    %c0_2 = arith.constant 0 : index
    %4 = vector.load %arg6[%c2, %c0_2] : memref<4x256xbf16, #tpu.memory_space<vmem>>, vector<1x20xbf16>
    %5 = arith.extf %4 : vector<1x20xbf16> to vector<1x20xf32>
    %c3 = arith.constant 3 : index
    %c0_3 = arith.constant 0 : index
    %6 = vector.load %arg6[%c3, %c0_3] : memref<4x256xbf16, #tpu.memory_space<vmem>>, vector<1x256xbf16>
    %7 = arith.extf %6 : vector<1x256xbf16> to vector<1x256xf32>
    %c0_4 = arith.constant 0 : index
    %c0_5 = arith.constant 0 : index
    %8 = vector.load %arg1[%c0_4, %c0_5] : memref<128x256xbf16, #tpu.memory_space<vmem>>, vector<128x256xbf16>
    %c0_6 = arith.constant 0 : index
    %c0_7 = arith.constant 0 : index
    %9 = vector.load %arg2[%c0_6, %c0_7] : memref<256x20xbf16, #tpu.memory_space<vmem>>, vector<256x20xbf16>
    %cst = arith.constant dense<0.000000e+00> : vector<128x20xf32>
    %10 = tpu.matmul %8, %9, %cst {dimension_numbers = #tpu.dot_dimension_numbers<[1], [0], [0], [1], [0, 0, 1, 1], [], []>} : vector<128x256xbf16>, vector<256x20xbf16>, vector<128x20xf32> -> vector<128x20xf32>
    %11 = vector.broadcast %1 : vector<1x20xf32> to vector<128x20xf32>
    %12 = arith.addf %10, %11 : vector<128x20xf32>
    %cst_8 = arith.constant 5.000000e-01 : f32
    %13 = vector.broadcast %cst_8 : f32 to vector<128x20xf32>
    %14 = arith.mulf %13, %12 : vector<128x20xf32>
    %15 = math.tanh %14 : vector<128x20xf32>
    %cst_9 = arith.constant 5.000000e-01 : f32
    %16 = vector.broadcast %cst_9 : f32 to vector<128x20xf32>
    %17 = arith.mulf %16, %15 : vector<128x20xf32>
    %cst_10 = arith.constant 5.000000e-01 : f32
    %18 = vector.broadcast %cst_10 : f32 to vector<128x20xf32>
    %19 = arith.addf %17, %18 : vector<128x20xf32>
    %20 = arith.truncf %19 : vector<128x20xf32> to vector<128x20xbf16>
    %c0_11 = arith.constant 0 : index
    %c0_12 = arith.constant 0 : index
    %21 = vector.load %arg3[%c0_11, %c0_12] : memref<20x10xbf16, #tpu.memory_space<vmem>>, vector<20x10xbf16>
    %cst_13 = arith.constant dense<0.000000e+00> : vector<128x10xf32>
    %22 = tpu.matmul %20, %21, %cst_13 {dimension_numbers = #tpu.dot_dimension_numbers<[1], [0], [0], [1], [0, 0, 1, 1], [], []>} : vector<128x20xbf16>, vector<20x10xbf16>, vector<128x10xf32> -> vector<128x10xf32>
    %23 = vector.broadcast %3 : vector<1x10xf32> to vector<128x10xf32>
    %24 = arith.addf %22, %23 : vector<128x10xf32>
    %cst_14 = arith.constant 5.000000e-01 : f32
    %25 = vector.broadcast %cst_14 : f32 to vector<128x10xf32>
    %26 = arith.mulf %25, %24 : vector<128x10xf32>
    %27 = math.tanh %26 : vector<128x10xf32>
    %cst_15 = arith.constant 5.000000e-01 : f32
    %28 = vector.broadcast %cst_15 : f32 to vector<128x10xf32>
    %29 = arith.mulf %28, %27 : vector<128x10xf32>
    %cst_16 = arith.constant 5.000000e-01 : f32
    %30 = vector.broadcast %cst_16 : f32 to vector<128x10xf32>
    %31 = arith.addf %29, %30 : vector<128x10xf32>
    %32 = arith.truncf %31 : vector<128x10xf32> to vector<128x10xbf16>
    %c0_17 = arith.constant 0 : index
    %c0_18 = arith.constant 0 : index
    %33 = vector.load %arg4[%c0_17, %c0_18] : memref<10x20xbf16, #tpu.memory_space<vmem>>, vector<10x20xbf16>
    %cst_19 = arith.constant dense<0.000000e+00> : vector<128x20xf32>
    %34 = tpu.matmul %32, %33, %cst_19 {dimension_numbers = #tpu.dot_dimension_numbers<[1], [0], [0], [1], [0, 0, 1, 1], [], []>} : vector<128x10xbf16>, vector<10x20xbf16>, vector<128x20xf32> -> vector<128x20xf32>
    %35 = vector.broadcast %5 : vector<1x20xf32> to vector<128x20xf32>
    %36 = arith.addf %34, %35 : vector<128x20xf32>
    %cst_20 = arith.constant 5.000000e-01 : f32
    %37 = vector.broadcast %cst_20 : f32 to vector<128x20xf32>
    %38 = arith.mulf %37, %36 : vector<128x20xf32>
    %39 = math.tanh %38 : vector<128x20xf32>
    %cst_21 = arith.constant 5.000000e-01 : f32
    %40 = vector.broadcast %cst_21 : f32 to vector<128x20xf32>
    %41 = arith.mulf %40, %39 : vector<128x20xf32>
    %cst_22 = arith.constant 5.000000e-01 : f32
    %42 = vector.broadcast %cst_22 : f32 to vector<128x20xf32>
    %43 = arith.addf %41, %42 : vector<128x20xf32>
    %44 = arith.truncf %43 : vector<128x20xf32> to vector<128x20xbf16>
    %c0_23 = arith.constant 0 : index
    %c0_24 = arith.constant 0 : index
    %45 = vector.load %arg5[%c0_23, %c0_24] : memref<20x256xbf16, #tpu.memory_space<vmem>>, vector<20x256xbf16>
    %cst_25 = arith.constant dense<0.000000e+00> : vector<128x256xf32>
    %46 = tpu.matmul %44, %45, %cst_25 {dimension_numbers = #tpu.dot_dimension_numbers<[1], [0], [0], [1], [0, 0, 1, 1], [], []>} : vector<128x20xbf16>, vector<20x256xbf16>, vector<128x256xf32> -> vector<128x256xf32>
    %47 = vector.broadcast %7 : vector<1x256xf32> to vector<128x256xf32>
    %48 = arith.addf %46, %47 : vector<128x256xf32>
    %49 = arith.truncf %48 : vector<128x256xf32> to vector<128x256xbf16>
    %c0_26 = arith.constant 0 : index
    %c0_27 = arith.constant 0 : index
    %50 = vector.load %arg7[%c0_26, %c0_27] : memref<128x256xbf16, #tpu.memory_space<vmem>>, vector<128x256xbf16>
    tpu.vector_store %arg7[%c0_26, %c0_27], %49 {strides = array<i32>} : memref<128x256xbf16, #tpu.memory_space<vmem>>, vector<128x256xbf16>,
    return
  }
  func.func @transform_0(%arg0: i32) -> (i32, i32) {
    %c0_i32 = arith.constant 0 : i32
    %c0_i32_0 = arith.constant 0 : i32
    return %arg0, %c0_i32 : i32, i32
  }
  func.func @transform_1(%arg0: i32) -> (i32, i32) {
    %c0_i32 = arith.constant 0 : i32
    %c0_i32_0 = arith.constant 0 : i32
    %c0_i32_1 = arith.constant 0 : i32
    return %c0_i32, %c0_i32_0 : i32, i32
  }
  func.func @transform_2(%arg0: i32) -> (i32, i32) {
    %c0_i32 = arith.constant 0 : i32
    %c0_i32_0 = arith.constant 0 : i32
    %c0_i32_1 = arith.constant 0 : i32
    return %c0_i32, %c0_i32_0 : i32, i32
  }
  func.func @transform_3(%arg0: i32) -> (i32, i32) {
    %c0_i32 = arith.constant 0 : i32
    %c0_i32_0 = arith.constant 0 : i32
    %c0_i32_1 = arith.constant 0 : i32
    return %c0_i32, %c0_i32_0 : i32, i32
  }
  func.func @transform_4(%arg0: i32) -> (i32, i32) {
    %c0_i32 = arith.constant 0 : i32
    %c0_i32_0 = arith.constant 0 : i32
    %c0_i32_1 = arith.constant 0 : i32
    return %c0_i32, %c0_i32_0 : i32, i32
  }
  func.func @transform_5(%arg0: i32) -> (i32, i32) {
    %c0_i32 = arith.constant 0 : i32
    %c0_i32_0 = arith.constant 0 : i32
    %c0_i32_1 = arith.constant 0 : i32
    return %c0_i32, %c0_i32_0 : i32, i32
  }
  func.func @transform_6(%arg0: i32) -> (i32, i32) {
    %c0_i32 = arith.constant 0 : i32
    %c0_i32_0 = arith.constant 0 : i32
    return %arg0, %c0_i32 : i32, i32
  }
}

</mosaic_0001>

<bundles_post_ra>
// kernel: tpu_custom_call.1
= control target key start
LH: loop header
LB: loop body
LE: loop exit
PB: predicated region body
PF: predicated region fallthrough
CT: control target
= control target key end

     0   :  { %11 = vsyncpa [#allocation3], 0  ;;  %s2476_s0 = inlined_call_operand.hbm [shape: bf16[512,256], index: 0, kind: input, shape index: {}]   ;;  %s2477_s1 = inlined_call_operand.vmem [shape: bf16[256,20], index: 1, kind: input, shape index: {}]   ;;  %s2478_s2 = inlined_call_operand.vmem [shape: bf16[20,10], index: 2, kind: input, shape index: {}]   ;;  %s2479_s3 = inlined_call_operand.vmem [shape: bf16[10,20], index: 3, kind: input, shape index: {}]   ;;  %s2480_s4 = inlined_call_operand.vmem [shape: bf16[20,256], index: 4, kind: input, shape index: {}]   ;;  %s2481_s5 = inlined_call_operand.vmem [shape: bf16[4,256], index: 5, kind: input, shape index: {}]   ;;  %s2482_s6 = inlined_call_operand.hbm [shape: bf16[512,256], index: 6, kind: output, shape index: {}]  }
   0x1   :  { %13 = vsyncpa [#allocation3 + $0x1], 0 }
   0x2   :  { %14 = vsyncpa [#allocation4], 0 }
   0x3   :  { %16 = vsyncpa [#allocation4 + $0x1], 0  ;;  %s2059_s21 = smov 0   ;;  %s2061_s22 = smov 0  }
   0x4   :  { %s2063_s23 = smov 0   ;;  %s2065_s24 = smov 0  }
   0x5 LB: > { %s2080_s25 = sadd.s32 4294967295, %s2015_s24   ;;  %s1480_s26 = sadd.s32 4294967294, %s2015_s24   ;;  %s2015_s24 = sphi %s2065_s24, %s2494_s24   ;;  %s2011_s23 = sphi %s2063_s23, %s2493_s23   ;;  %s2007_s22 = sphi %s2061_s22, %s2492_s22   ;;  %s2003_s21 = sphi %s2059_s21, %s2491_s21  }
   0x6   : > { %s2084_s27 = sadd.s32 1, %s2015_s24   ;;  %s29_s28 = sadd.s32 1, %s2011_s23 }
   0x7   : > { %s26_s29 = ssub.s32 %s2015_s24, %s2084_s27  ;;  %p36_p0 = scmp.ne.s32.totalorder %s2011_s23, %s2007_s22 }
   0x8   : > { %p27_p1 = scmp.eq.s32.totalorder %s26_s29, 0  ;;  %p37_p2 = scmp.eq.s32.totalorder %s2015_s24, 0 }
   0x9   : > { %p42_p3 = scmp.ne.s32.totalorder %s2007_s22, %s2003_s21  ;;  %p43_p4 = scmp.eq.s32.totalorder %s2080_s25, 0 }
   0xa   : > { %s2096_s30 = scalar_select %p27_p1, %s2011_s23, %s29_s28  }
   0xb   : > { %p2098_p5 = por %p37_p2, %p36_p0  ;;  %p2102_p6 = por %p43_p4, %p42_p3 }
   0xc   : > { %p171_p7 = scmp.eq.s32.totalorder %s2080_s25, 3  ;;  %p177_p8 = scmp.eq.s32.totalorder %s1480_s26, 3 }
   0xd   : > { %p1736_p9 = scmp.lt.s32.totalorder %s2015_s24, 4  ;;  %s212_s11 = sand.u32 1, %s2011_s23  }
   0xe   : > { %p2108_p10 = por %p171_p7, %p36_p0  ;;  %p2112_p11 = por %p177_p8, %p42_p3 }
   0xf   : > { %s1577_s12 = sshll.u32 %s2015_s24, 11  ;;  %s1483_s13 = sshll.u32 %s212_s11, 7 }
  0x10   : > { %s2486_s9 = scalar_select %p2108_p10, 1, 0 }
  0x11   : > { %s2487_s10 = scalar_select %p2112_p11, 1, 0 }
  0x12   : > { %s2121_s16 = scalar_lea.hbm %s2476_s0, %s1577_s12  ;;  %s216_s17 = scalar_lea.vmem [#allocation2], %s1483_s13 }
  0x13   : > { %s224_s18 = sshll.u32 %s216_s17, 4  ;;  %p2125_p12 = pnand %p1736_p9, %p2098_p5  ;;  %s2129_s18 = int_to_ptr.vmem [resolvable:$true] %s224_s18 }
  0x14   : > { %s2131_s20 = scalar_lea.sflag [#allocation3], %s212_s11  ;;  %s1919_s26 = scalar_lea.hbm %s2121_s16, 2048 }
  0x15   : > { %p1920_p13 = scmp.ne.s32.totalorder %s2121_s16, %s1919_s26  ;;  %p1921_p0 = pneg %p2125_p12 }
  0x16   : > { %s1924_s7 = scalar_lea.hbm %s2476_s0, 8192  ;;  %p1925_p3 = scmp.lt.u32.totalorder %s2121_s16, %s2476_s0 }
  0x17   : > { %p1922_p1 = pnand %p1921_p0, %p1920_p13  ;;  %p1926_p4 = scmp.lt.u32.totalorder %s1924_s7, %s1919_s26 }
  0x18   : > { %p1928_p7 = scmp.lt.u32.totalorder %s1919_s26, %s2121_s16 }
  0x19   : > { %p1923_p2 = pneg %p1922_p1  ;;  %p1927_p5 = por %p1926_p4, %p1925_p3 }
  0x1b   : > { %p1929_p8 = por %p1928_p7, %p1927_p5 }
  0x1d   : > { %p1930_p9 = pnand %p1929_p8, %p1923_p2 }
  0x1f   : > { %1933 = shalt.err (!%p1930_p9)
}
  0x20   : > { %s1934_s11 = scalar_lea.vmem %s2129_s18, 2048  ;;  %s2017_s14 = smov [#allocation2]  }
  0x21   : > { %p1935_p13 = scmp.ne.s32.totalorder %s2129_s18, %s1934_s11  ;;  %s1939_s15 = sshll.u32 %s2017_s14, 4  ;;  %s1940_s15 = int_to_ptr.vmem [resolvable:$false] %s1939_s15 }
  0x22   : > { %s1941_s17 = scalar_lea.vmem %s1940_s15, 4096  ;;  %p1942_p10 = scmp.lt.s32.totalorder %s2129_s18, %s1940_s15 }
  0x23   : > { %p1937_p1 = pnand %p1935_p13, %p1921_p0  ;;  %p1943_p3 = scmp.lt.s32.totalorder %s1941_s17, %s1934_s11 }
  0x25   : > { %p1938_p11 = pneg %p1937_p1  ;;  %p1944_p4 = por %p1943_p3, %p1942_p10 }
  0x27   : > { %p1945_p5 = pnand %p1944_p4, %p1938_p11 }
  0x29   : > { %1948 = shalt.err (!%p1945_p5)
}
  0x2a   : > { %s2018_s26 = smov 128   ;;  %s2019_s28 = smov 8  }
  0x2b   : > { %1731 = dma.hbm_to_vmem [thread:$0]  (!%p2125_p12), %s2121_s16, 2048, %s2129_s18, %s2131_s20, %s2018_s26, %s2018_s26, %s2019_s28  }
  0x2c   : > { %p1487_p0 = scmp.ge.s32.totalorder %s2015_s24, 1  ;;  %p232_p2 = scmp.lt.s32.totalorder %s2015_s24, 5 }
  0x2e   : > { %p233_p7 = pnand %p1487_p0, %p232_p2 }
  0x2f   : > { %s2162_s29 = sand.u32 (!%p233_p7), 1, %s2007_s22  }
  0x30   : > { %236 = sbr.rel (%p233_p7) target bundleno = 1098 (0x44a), region = 44  ;;  %s1488_s7 = sshll.u32 (!%p233_p7), %s2162_s29, 7 }
  0x31   : > { %s239_s12 = scalar_lea.sflag (!%p233_p7), [#allocation3], %s2162_s29  ;;  %s2168_s13 = scalar_lea.vmem (!%p233_p7), [#allocation2], %s1488_s7 }
  0x37   : > { %1994 = dma.done.wait (%p2102_p6), %s239_s12, 2048  }
  0x38   : > { %1996 = vsyncadd (%p2102_p6), %s239_s12, 4294965248  ;;  %v1775_v0 = vld [vmem:[%s2477_s1 + $0x40] sm:$0xff]   ;;  %v1777_v2 = vld [vmem:[%s2477_s1 + $0x48] sm:$0xff]   ;;  %vm718_vm0 = vcmask 1041408   ;;  %v328_v35 = vlaneseq  ;;  %vm693_vm1 = vcmask 162816   ;;  %vm927_vm2 = vcmask 1044480  }
  0x39   : > { %v1776_v1 = vld [vmem:[%s2477_s1] sm:$0xff]   ;;  %1596 = vmatprep.subr.bf16.mxu0 %v1775_v0  ;;  %v1778_v3 = vld [vmem:[%s2477_s1 + $0x8] sm:$0xff]   ;;  %v1779_v4 = vld [vmem:[%s2477_s1 + $0x50] sm:$0xff]   ;;  %vm902_vm3 = vcmask 80896   ;;  %s2380_s18 = scalar_lea.vmem [#allocation5], %s1488_s7  ;;  %s1595_s7 = sshll.u32 %s2080_s25, 11 }
  0x3a   : > { %1597 = vmatpush3.bf16.msra.mxu0 %v1776_v1  ;;  %v1780_v5 = vld [vmem:[%s2477_s1 + $0x10] sm:$0xff]   ;;  %v1781_v6 = vld [vmem:[%s2477_s1 + $0x58] sm:$0xff]   ;;  %v1783_v8 = vld [vmem:[%s2477_s1 + $0x60] sm:$0xff]   ;;  %v2247_v36 = vshrl.u32 %v328_v35, 7  ;;  %s2429_s11 = scalar_lea.hbm %s2482_s6, %s1595_s7  ;;  %s1393_s25 = scalar_lea.sflag [#allocation4], %s2162_s29 }
  0x3b   : > { %1598 = vmatprep.subr.bf16.mxu0 %v1777_v2  ;;  %v1782_v7 = vld [vmem:[%s2477_s1 + $0x18] sm:$0xff]   ;;  %v1784_v9 = vld [vmem:[%s2477_s1 + $0x20] sm:$0xff]   ;;  %v1785_v10 = vld [vmem:[%s2477_s1 + $0x68] sm:$0xff]   ;;  %p2489_p10 = scmp.ne.s32.totalorder %s2486_s9, 0  ;;  %s2021_s15 = smov [#allocation5]  }
  0x3c   : > { %v1793_v11 = vld [vmem:[%s2168_s13 + $0x4] ss:$8 sps:$4 sm:$0xff]   ;;  %v1787_v13 = vld [vmem:[%s2477_s1 + $0x70] sm:$0xff]   ;;  %v1789_v15 = vld [vmem:[%s2477_s1 + $0x78] sm:$0xff]   ;;  %v330_v39 = vsub.s32 0, %v2247_v36  ;;  %s1953_s17 = sshll.u32 %s2021_s15, 4  ;;  %s1954_s17 = int_to_ptr.vmem [resolvable:$false] %s1953_s17 }
  0x3d   : > { %v1786_v12 = vld [vmem:[%s2477_s1 + $0x28] sm:$0xff]   ;;  %540 = vmatprep.mubr.bf16.mxu0 %v1793_v11  ;;  %v1788_v14 = vld [vmem:[%s2477_s1 + $0x30] sm:$0xff]   ;;  %v1790_v16 = vld [vmem:[%s2477_s1 + $0x38] sm:$0xff]   ;;  %s1955_s8 = scalar_lea.vmem %s1954_s17, 4096 }
  0x3e   : > { %1599 = vmatpush3.bf16.msra.mxu0 %v1778_v3  ;;  %v1815_v17 = vld [vmem:[%s2478_s2] sm:$0xff]   ;;  %v1794_v19 = vld [vmem:[%s2168_s13 + $0x14] ss:$8 sps:$4 sm:$0xff]   ;;  %v1796_v20 = vld [vmem:[%s2168_s13 + $0x10] ss:$8 sps:$4 sm:$0xff]  }
  0x3f   : > { %1600 = vmatprep.subr.bf16.mxu0 %v1779_v4  ;;  %1717 = vmatprep.subr.bf16.mxu1 %v1815_v17  ;;  %v1791_v18 = vld [vmem:[%s2168_s13] ss:$8 sps:$4 sm:$0xff]   ;;  %v1797_v21 = vld [vmem:[%s2168_s13 + $0x24] ss:$8 sps:$4 sm:$0xff]   ;;  %v1800_v23 = vld [vmem:[%s2168_s13 + $0x34] ss:$8 sps:$4 sm:$0xff]  }
  0x40   : > { %1719 = vmatpush3.bf16.msra.mxu1 %v1815_v17  ;;  %v1799_v22 = vld [vmem:[%s2168_s13 + $0x20] ss:$8 sps:$4 sm:$0xff]   ;;  %v1802_v24 = vld [vmem:[%s2168_s13 + $0x30] ss:$8 sps:$4 sm:$0xff]   ;;  %v1803_v25 = vld [vmem:[%s2168_s13 + $0x44] ss:$8 sps:$4 sm:$0xff]  }
  0x41   : > { %v1805_v26 = vld [vmem:[%s2168_s13 + $0x40] ss:$8 sps:$4 sm:$0xff]   ;;  %v1806_v27 = vld [vmem:[%s2168_s13 + $0x54] ss:$8 sps:$4 sm:$0xff]   ;;  %v1808_v28 = vld [vmem:[%s2168_s13 + $0x50] ss:$8 sps:$4 sm:$0xff]  }
  0x42   : > { %1601 = vmatpush3.bf16.msra.mxu0 %v1780_v5  ;;  %v1809_v29 = vld [vmem:[%s2168_s13 + $0x64] ss:$8 sps:$4 sm:$0xff]   ;;  %v1811_v30 = vld [vmem:[%s2168_s13 + $0x60] ss:$8 sps:$4 sm:$0xff]   ;;  %v1812_v31 = vld [vmem:[%s2168_s13 + $0x74] ss:$8 sps:$4 sm:$0xff]  }
  0x43   : > { %1602 = vmatprep.subr.bf16.mxu0 %v1781_v6  ;;  %v1814_v32 = vld [vmem:[%s2168_s13 + $0x70] ss:$8 sps:$4 sm:$0xff]   ;;  %v1816_v33 = vld [vmem:[%s2478_s2 + $0x8] ss:$0 sps:$4 sm:$0x33]   ;;  %s1407_s13 = sshll.u32 %s2380_s18, 4  ;;  %s2431_s13 = int_to_ptr.vmem [resolvable:$true] %s1407_s13 }
  0x44   : > { %v720_v34 = vsel %vm718_vm0, %v1816_v33, 0  ;;  %1722 = vmatprep.subr.msk.bf16.mxu1 %vm718_vm0, %v1816_v33  ;;  %v2252_v37 = vld [vmem:[%s2481_s5] sm:$0x1]  ;;  %s1949_s14 = scalar_lea.vmem %s2431_s13, 2048  ;;  %p1956_p8 = scmp.lt.s32.totalorder %s2431_s13, %s1954_s17 }
  0x45   : > { %1720 = vmatpush3.bf16.msra.mxu1 %v720_v34  ;;  %v275_v38 = vunpack.c.l.bf16 %v2252_v37  ;;  %p1950_p6 = scmp.ne.s32.totalorder %s2431_s13, %s1949_s14  ;;  %p1957_p9 = scmp.lt.s32.totalorder %s1955_s8, %s1949_s14 }
  0x46   : > { %1603 = vmatpush3.bf16.msra.mxu0 %v1782_v7 }
  0x47   : > { %1604 = vmatprep.subr.bf16.mxu0 %v1783_v8  ;;  %v2258_v41 = vrot.slane %v275_v38, %v330_v39  ;;  %p1951_p11 = pnand %p1950_p6, %p2489_p10  ;;  %p1958_p13 = por %p1957_p9, %p1956_p8 }
  0x49   : > { %p1952_p12 = pneg %p1951_p11 }
  0x4a   : > { %1605 = vmatpush3.bf16.msra.mxu0 %v1784_v9 }
  0x4b   : > { %1606 = vmatprep.subr.bf16.mxu0 %v1785_v10  ;;  %p1959_p1 = pnand %p1958_p13, %p1952_p12 }
  0x4e   : > { %1607 = vmatpush3.bf16.msra.mxu0 %v1786_v12 }
  0x4f   : > { %1608 = vmatprep.subr.bf16.mxu0 %v1787_v13 }
  0x52   : > { %1609 = vmatpush3.bf16.msra.mxu0 %v1788_v14 }
  0x53   : > { %1610 = vmatprep.subr.bf16.mxu0 %v1789_v15 }
  0x56   : > { %1611 = vmatpush3.bf16.msra.mxu0 %v1790_v16 }
  0x57   : > { %1679 = vmatprep.subr.bf16.mxu0 %v1815_v17 }
  0x59   : > { %541 = vmatmul.mubr.bf16.vlgmr.msra.gmra.mrb[0].mxu0 %v1791_v18 }
  0x5a   : > { %548 = vmatprep.mubr.bf16.mxu0 %v1794_v19  ;;  %1680 = vmatpush3.bf16.msra.mxu0 %v1815_v17 }
  0x5b   : > { %1721 = vmatprep.subr.msk.bf16.mxu0 %vm718_vm0, %v1816_v33 }
  0x5e   : > { %1682 = vmatpush3.bf16.msra.mxu0 %v720_v34 }
  0x61   : > { %549 = vmatmul.mubr.bf16.gmra.mrb[4].mxu0 %v1796_v20 }
  0x62   : > { %556 = vmatprep.mubr.bf16.mxu0 %v1797_v21 }
  0x69   : > { %557 = vmatmul.mubr.bf16.gmra.mrb[8].mxu0 %v1799_v22 }
  0x6a   : > { %564 = vmatprep.mubr.bf16.mxu0 %v1800_v23 }
  0x71   : > { %565 = vmatmul.mubr.bf16.gmra.mrb[12].mxu0 %v1802_v24 }
  0x72   : > { %572 = vmatprep.mubr.bf16.mxu0 %v1803_v25 }
  0x79   : > { %573 = vmatmul.mubr.bf16.gmra.mrb[16].mxu0 %v1805_v26 }
  0x7a   : > { %580 = vmatprep.mubr.bf16.mxu0 %v1806_v27 }
  0x81   : > { %581 = vmatmul.mubr.bf16.gmra.mrb[20].mxu0 %v1808_v28 }
  0x82   : > { %588 = vmatprep.mubr.bf16.mxu0 %v1809_v29 }
  0x89   : > { %589 = vmatmul.mubr.bf16.gmra.mrb[24].mxu0 %v1811_v30 }
  0x8a   : > { %596 = vmatprep.mubr.bf16.mxu0 %v1812_v31 }
  0x91   : > { %597 = vmatmul.mubr.bf16.gmra.mrb[28].mxu0 %v1814_v32 }
 0x12c   : > { %v1612_v40 = vpop.f32.mrb[0].mxu0 }
 0x12d   : > { %v1613_v42 = vpop.f32.mrb[1].mxu0 }
 0x12e   : > { %v1614_v43 = vadd.f32 %v1613_v42, %v1612_v40  ;;  %v1615_v44 = vpop.f32.mrb[2].mxu0 }
 0x12f   : > { %v1616_v45 = vpop.f32.mrb[3].mxu0 }
 0x130   : > { %v543_v46 = vadd.f32 %v1614_v43, %v2258_v41  ;;  %v1617_v47 = vadd.f32 %v1616_v45, %v1615_v44 }
 0x132   : > { %v605_v48 = vmul.f32 0.5, %v543_v46  ;;  %v546_v49 = vadd.f32 %v1617_v47, %v2258_v41 }
 0x134   : > { %1823 = vtanh.f32 %v605_v48  ;;  %v606_v50 = vmul.f32 0.5, %v546_v49  ;;  %v1618_v51 = vpop.f32.mrb[4].mxu0 }
 0x135   : > { %v1619_v52 = vpop.f32.mrb[5].mxu0 }
 0x136   : > { %1825 = vtanh.f32 %v606_v50  ;;  %v1620_v53 = vadd.f32 %v1619_v52, %v1618_v51  ;;  %v1621_v54 = vpop.f32.mrb[6].mxu0 }
 0x137   : > { %v1622_v55 = vpop.f32.mrb[7].mxu0 }
 0x138   : > { %v551_v56 = vadd.f32 %v1620_v53, %v2258_v41  ;;  %v1623_v57 = vadd.f32 %v1622_v55, %v1621_v54 }
 0x13a   : > { %v607_v58 = vmul.f32 0.5, %v551_v56  ;;  %v554_v59 = vadd.f32 %v1623_v57, %v2258_v41 }
 0x13c   : > { %1827 = vtanh.f32 %v607_v58  ;;  %v608_v60 = vmul.f32 0.5, %v554_v59  ;;  %v1624_v61 = vpop.f32.mrb[8].mxu0 }
 0x13d   : > { %v1625_v62 = vpop.f32.mrb[9].mxu0 }
 0x13e   : > { %v1824_v63 = vpop.eup %1823  ;;  %1829 = vtanh.f32 %v608_v60  ;;  %v1626_v0 = vadd.f32 %v1625_v62, %v1624_v61  ;;  %v1627_v1 = vpop.f32.mrb[10].mxu0 }
 0x13f   : > { %v637_v2 = vmul.f32 0.5, %v1824_v63  ;;  %v1628_v3 = vpop.f32.mrb[11].mxu0 }
 0x140   : > { %v1826_v4 = vpop.eup %1825  ;;  %v559_v5 = vadd.f32 %v1626_v0, %v2258_v41  ;;  %v1629_v6 = vadd.f32 %v1628_v3, %v1627_v1 }
 0x141   : > { %v638_v7 = vmul.f32 0.5, %v1826_v4  ;;  %v653_v10 = vadd.f32 0.5, %v637_v2 }
 0x142   : > { %v609_v8 = vmul.f32 0.5, %v559_v5  ;;  %v562_v9 = vadd.f32 %v1629_v6, %v2258_v41 }
 0x143   : > { %v654_v11 = vadd.f32 0.5, %v638_v7 }
 0x144   : > { %1831 = vtanh.f32 %v609_v8  ;;  %v610_v12 = vmul.f32 0.5, %v562_v9  ;;  %v1630_v13 = vpop.f32.mrb[12].mxu0 }
 0x145   : > { %v1631_v14 = vpop.f32.mrb[13].mxu0  ;;  %v669_v15 = vpack.c.bf16 %v654_v11, %v653_v10 }
 0x146   : > { %v1828_v16 = vpop.eup %1827  ;;  %1833 = vtanh.f32 %v610_v12  ;;  %v1632_v17 = vadd.f32 %v1631_v14, %v1630_v13  ;;  %v1633_v18 = vpop.f32.mrb[14].mxu0 }
 0x147   : > { %v639_v19 = vmul.f32 0.5, %v1828_v16  ;;  %v1634_v20 = vpop.f32.mrb[15].mxu0  ;;  %1683 = vmatprep.mubr.msk.bf16.mxu0 %vm693_vm1, %v669_v15 }
 0x148   : > { %v1830_v21 = vpop.eup %1829  ;;  %v567_v22 = vadd.f32 %v1632_v17, %v2258_v41  ;;  %v1635_v23 = vadd.f32 %v1634_v20, %v1633_v18 }
 0x149   : > { %v640_v24 = vmul.f32 0.5, %v1830_v21  ;;  %v655_v27 = vadd.f32 0.5, %v639_v19 }
 0x14a   : > { %v611_v25 = vmul.f32 0.5, %v567_v22  ;;  %v570_v26 = vadd.f32 %v1635_v23, %v2258_v41 }
 0x14b   : > { %v656_v28 = vadd.f32 0.5, %v640_v24 }
 0x14c   : > { %1835 = vtanh.f32 %v611_v25  ;;  %v612_v29 = vmul.f32 0.5, %v570_v26  ;;  %v1636_v30 = vpop.f32.mrb[16].mxu0 }
 0x14d   : > { %v670_v31 = vpack.c.bf16 %v656_v28, %v655_v27  ;;  %v1637_v32 = vpop.f32.mrb[17].mxu0 }
 0x14e   : > { %v1832_v33 = vpop.eup %1831  ;;  %1837 = vtanh.f32 %v612_v29  ;;  %v1638_v34 = vadd.f32 %v1637_v32, %v1636_v30  ;;  %v1639_v35 = vpop.f32.mrb[18].mxu0 }
 0x14f   : > { %v641_v39 = vmul.f32 0.5, %v1832_v33  ;;  %v1640_v40 = vpop.f32.mrb[19].mxu0  ;;  %1684 = vmatmul.mubr.msk.bf16.vlgmr.msra.gmra.mrb[32].mxu0 %vm693_vm1, %v670_v31 }
 0x150   : > { %v1834_v42 = vpop.eup %1833  ;;  %v575_v43 = vadd.f32 %v1638_v34, %v2258_v41  ;;  %v1641_v44 = vadd.f32 %v1640_v40, %v1639_v35 }
 0x151   : > { %v642_v45 = vmul.f32 0.5, %v1834_v42  ;;  %v657_v48 = vadd.f32 0.5, %v641_v39 }
 0x152   : > { %v613_v46 = vmul.f32 0.5, %v575_v43  ;;  %v578_v47 = vadd.f32 %v1641_v44, %v2258_v41 }
 0x153   : > { %v658_v49 = vadd.f32 0.5, %v642_v45 }
 0x154   : > { %1839 = vtanh.f32 %v613_v46  ;;  %v614_v50 = vmul.f32 0.5, %v578_v47  ;;  %v1642_v51 = vpop.f32.mrb[20].mxu0 }
 0x155   : > { %v1643_v52 = vpop.f32.mrb[21].mxu0  ;;  %v671_v53 = vpack.c.bf16 %v658_v49, %v657_v48 }
 0x156   : > { %v1836_v54 = vpop.eup %1835  ;;  %1841 = vtanh.f32 %v614_v50  ;;  %v1644_v55 = vadd.f32 %v1643_v52, %v1642_v51  ;;  %v1645_v56 = vpop.f32.mrb[22].mxu0 }
 0x157   : > { %v643_v57 = vmul.f32 0.5, %v1836_v54  ;;  %v1646_v58 = vpop.f32.mrb[23].mxu0  ;;  %1687 = vmatprep.mubr.msk.bf16.mxu0 %vm693_vm1, %v671_v53 }
 0x158   : > { %v1838_v59 = vpop.eup %1837  ;;  %v583_v60 = vadd.f32 %v1644_v55, %v2258_v41  ;;  %v1647_v61 = vadd.f32 %v1646_v58, %v1645_v56  ;;  %v1817_v56 = vld [vmem:[%s2479_s3] sm:$0x1f]  }
 0x159   : > { %v644_v62 = vmul.f32 0.5, %v1838_v59  ;;  %v659_v1 = vadd.f32 0.5, %v643_v57  ;;  %1723 = vmatprep.subr.msk.bf16.mxu1 %vm927_vm2, %v1817_v56  ;;  %v929_v57 = vsel %vm927_vm2, %v1817_v56, 0  ;;  %v1820_v58 = vld [vmem:[%s2480_s4 + $0x4] ss:$8 sps:$4 sm:$0xff]   ;;  %v682_v59 = vsub.s32 1, %v2247_v36 }
 0x15a   : > { %v615_v63 = vmul.f32 0.5, %v583_v60  ;;  %v586_v0 = vadd.f32 %v1647_v61, %v2258_v41 }
 0x15b   : > { %v660_v2 = vadd.f32 0.5, %v644_v62  ;;  %v2293_v60 = vrot.slane %v275_v38, %v682_v59 }
 0x15c   : > { %1843 = vtanh.f32 %v615_v63  ;;  %v616_v3 = vmul.f32 0.5, %v586_v0  ;;  %v1648_v4 = vpop.f32.mrb[24].mxu0 }
 0x15d   : > { %v1649_v5 = vpop.f32.mrb[25].mxu0  ;;  %v672_v6 = vpack.c.bf16 %v660_v2, %v659_v1 }
 0x15e   : > { %v1840_v7 = vpop.eup %1839  ;;  %1845 = vtanh.f32 %v616_v3  ;;  %v1650_v8 = vadd.f32 %v1649_v5, %v1648_v4  ;;  %v1651_v9 = vpop.f32.mrb[26].mxu0 }
 0x15f   : > { %v645_v10 = vmul.f32 0.5, %v1840_v7  ;;  %v1652_v11 = vpop.f32.mrb[27].mxu0  ;;  %1688 = vmatmul.mubr.msk.bf16.gmra.mrb[36].mxu0 %vm693_vm1, %v672_v6 }
 0x160   : > { %v1842_v12 = vpop.eup %1841  ;;  %v591_v13 = vadd.f32 %v1650_v8, %v2258_v41  ;;  %v1653_v14 = vadd.f32 %v1652_v11, %v1651_v9 }
 0x161   : > { %v646_v15 = vmul.f32 0.5, %v1842_v12  ;;  %v661_v18 = vadd.f32 0.5, %v645_v10 }
 0x162   : > { %v617_v16 = vmul.f32 0.5, %v591_v13  ;;  %v594_v17 = vadd.f32 %v1653_v14, %v2258_v41 }
 0x163   : > { %v662_v19 = vadd.f32 0.5, %v646_v15 }
 0x164   : > { %1847 = vtanh.f32 %v617_v16  ;;  %v618_v20 = vmul.f32 0.5, %v594_v17  ;;  %v1654_v21 = vpop.f32.mrb[28].mxu0 }
 0x165   : > { %v1655_v22 = vpop.f32.mrb[29].mxu0  ;;  %v673_v23 = vpack.c.bf16 %v662_v19, %v661_v18 }
 0x166   : > { %v1844_v24 = vpop.eup %1843  ;;  %1849 = vtanh.f32 %v618_v20  ;;  %v1656_v25 = vadd.f32 %v1655_v22, %v1654_v21  ;;  %v1657_v26 = vpop.f32.mrb[30].mxu0 }
 0x167   : > { %v647_v27 = vmul.f32 0.5, %v1844_v24  ;;  %v1658_v28 = vpop.f32.mrb[31].mxu0  ;;  %1691 = vmatprep.mubr.msk.bf16.mxu0 %vm693_vm1, %v673_v23 }
 0x168   : > { %v1846_v29 = vpop.eup %1845  ;;  %v599_v30 = vadd.f32 %v1656_v25, %v2258_v41  ;;  %v1659_v31 = vadd.f32 %v1658_v28, %v1657_v26 }
 0x169   : > { %v648_v32 = vmul.f32 0.5, %v1846_v29  ;;  %v663_v35 = vadd.f32 0.5, %v647_v27 }
 0x16a   : > { %v619_v33 = vmul.f32 0.5, %v599_v30  ;;  %v602_v34 = vadd.f32 %v1659_v31, %v2258_v41 }
 0x16b   : > { %v664_v39 = vadd.f32 0.5, %v648_v32 }
 0x16c   : > { %1851 = vtanh.f32 %v619_v33  ;;  %v620_v40 = vmul.f32 0.5, %v602_v34  ;;  %v1818_v33 = vld [vmem:[%s2480_s4] ss:$8 sps:$4 sm:$0xff]  }
 0x16d   : > { %v674_v42 = vpack.c.bf16 %v664_v39, %v663_v35 }
 0x16e   : > { %v1848_v43 = vpop.eup %1847  ;;  %1853 = vtanh.f32 %v620_v40 }
 0x16f   : > { %1692 = vmatmul.mubr.msk.bf16.gmra.mrb[40].mxu0 %vm693_vm1, %v674_v42  ;;  %v649_v44 = vmul.f32 0.5, %v1848_v43 }
 0x170   : > { %v1850_v45 = vpop.eup %1849 }
 0x171   : > { %v650_v46 = vmul.f32 0.5, %v1850_v45  ;;  %v665_v47 = vadd.f32 0.5, %v649_v44 }
 0x173   : > { %v666_v48 = vadd.f32 0.5, %v650_v46 }
 0x175   : > { %v675_v49 = vpack.c.bf16 %v666_v48, %v665_v47 }
 0x176   : > { %v1852_v50 = vpop.eup %1851 }
 0x177   : > { %v651_v51 = vmul.f32 0.5, %v1852_v50  ;;  %1695 = vmatprep.mubr.msk.bf16.mxu1 %vm693_vm1, %v675_v49 }
 0x178   : > { %v1854_v41 = vpop.eup %1853 }
 0x179   : > { %v652_v52 = vmul.f32 0.5, %v1854_v41  ;;  %v667_v53 = vadd.f32 0.5, %v651_v51 }
 0x17b   : > { %v668_v54 = vadd.f32 0.5, %v652_v52 }
 0x17d   : > { %v676_v55 = vpack.c.bf16 %v668_v54, %v667_v53 }
 0x17f   : > { %1696 = vmatmul.mubr.msk.bf16.vlgmr.msra.gmra.mrb[0].mxu1 %vm693_vm1, %v676_v55 }
 0x180   : > { %1700 = vmatpush3.bf16.msra.mxu1 %v929_v57 }
 0x181   : > { %1167 = vmatprep.subr.bf16.mxu1 %v1820_v58 }
 0x222   : > { %v1685_v61 = vpop.f32.mrb[32].mxu0 }
 0x223   : > { %v765_v62 = vadd.f32 %v1685_v61, %v2293_v60  ;;  %v756_v63 = vpop.f32.mrb[33].mxu0 }
 0x224   : > { %v757_v0 = vadd.f32 %v756_v63, %v2293_v60  ;;  %v1686_v1 = vpop.f32.mrb[34].mxu0 }
 0x225   : > { %v821_v2 = vmul.f32 0.5, %v765_v62  ;;  %v768_v3 = vadd.f32 %v1686_v1, %v2293_v60  ;;  %v759_v4 = vpop.f32.mrb[35].mxu0 }
 0x226   : > { %v819_v5 = vmul.f32 0.5, %v757_v0  ;;  %v760_v6 = vadd.f32 %v759_v4, %v2293_v60 }
 0x227   : > { %1855 = vtanh.f32 %v821_v2  ;;  %v822_v7 = vmul.f32 0.5, %v768_v3 }
 0x228   : > { %1857 = vtanh.f32 %v819_v5  ;;  %v820_v37 = vmul.f32 0.5, %v760_v6 }
 0x229   : > { %1859 = vtanh.f32 %v822_v7 }
 0x22a   : > { %1861 = vtanh.f32 %v820_v37 }
 0x231   : > { %v1856_v38 = vpop.eup %1855 }
 0x232   : > { %v1858_v8 = vpop.eup %1857  ;;  %v853_v9 = vmul.f32 0.5, %v1856_v38  ;;  %v1689_v10 = vpop.f32.mrb[36].mxu0 }
 0x233   : > { %v1860_v11 = vpop.eup %1859  ;;  %v851_v12 = vmul.f32 0.5, %v1858_v8  ;;  %v781_v13 = vadd.f32 %v1689_v10, %v2293_v60  ;;  %v772_v14 = vpop.f32.mrb[37].mxu0 }
 0x234   : > { %v1862_v15 = vpop.eup %1861  ;;  %v854_v16 = vmul.f32 0.5, %v1860_v11  ;;  %v773_v17 = vadd.f32 %v772_v14, %v2293_v60  ;;  %v1690_v18 = vpop.f32.mrb[38].mxu0  ;;  %v869_v23 = vadd.f32 0.5, %v853_v9 }
 0x235   : > { %v852_v19 = vmul.f32 0.5, %v1862_v15  ;;  %v825_v20 = vmul.f32 0.5, %v781_v13  ;;  %v784_v21 = vadd.f32 %v1690_v18, %v2293_v60  ;;  %v775_v22 = vpop.f32.mrb[39].mxu0  ;;  %v867_v27 = vadd.f32 0.5, %v851_v12 }
 0x236   : > { %v870_v24 = vadd.f32 0.5, %v854_v16  ;;  %v823_v25 = vmul.f32 0.5, %v773_v17  ;;  %v776_v26 = vadd.f32 %v775_v22, %v2293_v60 }
 0x237   : > { %v868_v28 = vadd.f32 0.5, %v852_v19  ;;  %1863 = vtanh.f32 %v825_v20  ;;  %v826_v29 = vmul.f32 0.5, %v784_v21 }
 0x238   : > { %v884_v30 = vpack.c.bf16 %v870_v24, %v869_v23  ;;  %1865 = vtanh.f32 %v823_v25  ;;  %v824_v31 = vmul.f32 0.5, %v776_v26 }
 0x239   : > { %v883_v32 = vpack.c.bf16 %v868_v28, %v867_v27  ;;  %1867 = vtanh.f32 %v826_v29 }
 0x23a   : > { %1869 = vtanh.f32 %v824_v31 }
 0x23b   : > { %1701 = vmatprep.mubr.msk.bf16.mxu1 %vm902_vm3, %v883_v32 }
 0x23c   : > { %1702 = vmatmul.mubr.msk.bf16.vlgmr.msra.gmra.mrb[4].mxu1 %vm902_vm3, %v884_v30 }
 0x23d   : > { %1168 = vmatpush1.bf16.msra.mxu1 %v1818_v33 }
 0x241   : > { %v1864_v34 = vpop.eup %1863 }
 0x242   : > { %v1866_v35 = vpop.eup %1865  ;;  %v857_v39 = vmul.f32 0.5, %v1864_v34  ;;  %v1693_v40 = vpop.f32.mrb[40].mxu0 }
 0x243   : > { %v1868_v42 = vpop.eup %1867  ;;  %v855_v43 = vmul.f32 0.5, %v1866_v35  ;;  %v797_v44 = vadd.f32 %v1693_v40, %v2293_v60  ;;  %v788_v45 = vpop.f32.mrb[41].mxu0  ;;  %v1102_v40 = vld [vmem:[%s2480_s4 + $0x10] sm:$0x33] }
 0x244   : > { %v1870_v46 = vpop.eup %1869  ;;  %v858_v47 = vmul.f32 0.5, %v1868_v42  ;;  %v789_v48 = vadd.f32 %v788_v45, %v2293_v60  ;;  %v1694_v49 = vpop.f32.mrb[42].mxu0  ;;  %v873_v53 = vadd.f32 0.5, %v857_v39  ;;  %v1544_v42 = vcombine.high %v1102_v40, %v1102_v40 }
 0x245   : > { %v856_v50 = vmul.f32 0.5, %v1870_v46  ;;  %v829_v51 = vmul.f32 0.5, %v797_v44  ;;  %v800_v41 = vadd.f32 %v1694_v49, %v2293_v60  ;;  %v791_v52 = vpop.f32.mrb[43].mxu0  ;;  %v871_v57 = vadd.f32 0.5, %v855_v43  ;;  %v276_v46 = vld [vmem:[%s2481_s5] sm:$0x2] }
 0x246   : > { %v874_v54 = vadd.f32 0.5, %v858_v47  ;;  %v827_v55 = vmul.f32 0.5, %v789_v48  ;;  %v792_v56 = vadd.f32 %v791_v52, %v2293_v60  ;;  %v1543_v43 = vcombine.low %v1102_v40, %v1102_v40  ;;  %1545 = vmatprep.subr.msk.bf16.mxu1 %vm718_vm0, %v1544_v42 }
 0x247   : > { %v872_v58 = vadd.f32 0.5, %v856_v50  ;;  %1871 = vtanh.f32 %v829_v51  ;;  %v830_v59 = vmul.f32 0.5, %v800_v41  ;;  %v2020_v45 = vmov 0  }
 0x248   : > { %v886_v61 = vpack.c.bf16 %v874_v54, %v873_v53  ;;  %1873 = vtanh.f32 %v827_v55  ;;  %v828_v62 = vmul.f32 0.5, %v792_v56  ;;  %v1162_v44 = vsel %vm718_vm0, %v1543_v43, 0 }
 0x249   : > { %v885_v63 = vpack.c.bf16 %v872_v58, %v871_v57  ;;  %1875 = vtanh.f32 %v830_v59  ;;  %1170 = vmatpush1.bf16.msra.mxu1 %v1162_v44  ;;  %v277_v47 = vunpack.c.l.bf16 %v276_v46  ;;  %v895_v48 = vsub.s32 2, %v2247_v36 }
 0x24a   : > { %1877 = vtanh.f32 %v828_v62 }
 0x24b   : > { %1705 = vmatprep.mubr.msk.bf16.mxu1 %vm902_vm3, %v885_v63  ;;  %v2332_v49 = vrot.slane %v277_v47, %v895_v48 }
 0x24c   : > { %1706 = vmatmul.mubr.msk.bf16.gmra.mrb[8].mxu1 %vm902_vm3, %v886_v61 }
 0x251   : > { %v1872_v0 = vpop.eup %1871 }
 0x252   : > { %v1874_v1 = vpop.eup %1873  ;;  %v861_v2 = vmul.f32 0.5, %v1872_v0  ;;  %v1697_v3 = vpop.f32.mrb[0].mxu1 }
 0x253   : > { %v1876_v4 = vpop.eup %1875  ;;  %v859_v5 = vmul.f32 0.5, %v1874_v1  ;;  %v813_v6 = vadd.f32 %v1697_v3, %v2293_v60  ;;  %v804_v7 = vpop.f32.mrb[1].mxu1 }
 0x254   : > { %v1878_v37 = vpop.eup %1877  ;;  %v862_v38 = vmul.f32 0.5, %v1876_v4  ;;  %v805_v8 = vadd.f32 %v804_v7, %v2293_v60  ;;  %v1698_v9 = vpop.f32.mrb[2].mxu1  ;;  %v877_v14 = vadd.f32 0.5, %v861_v2 }
 0x255   : > { %v860_v10 = vmul.f32 0.5, %v1878_v37  ;;  %v833_v11 = vmul.f32 0.5, %v813_v6  ;;  %v816_v12 = vadd.f32 %v1698_v9, %v2293_v60  ;;  %v807_v13 = vpop.f32.mrb[3].mxu1  ;;  %v875_v18 = vadd.f32 0.5, %v859_v5 }
 0x256   : > { %v878_v15 = vadd.f32 0.5, %v862_v38  ;;  %v831_v16 = vmul.f32 0.5, %v805_v8  ;;  %v808_v17 = vadd.f32 %v807_v13, %v2293_v60 }
 0x257   : > { %v876_v19 = vadd.f32 0.5, %v860_v10  ;;  %1879 = vtanh.f32 %v833_v11  ;;  %v834_v20 = vmul.f32 0.5, %v816_v12 }
 0x258   : > { %v888_v21 = vpack.c.bf16 %v878_v15, %v877_v14  ;;  %1881 = vtanh.f32 %v831_v16  ;;  %v832_v22 = vmul.f32 0.5, %v808_v17 }
 0x259   : > { %v887_v23 = vpack.c.bf16 %v876_v19, %v875_v18  ;;  %1883 = vtanh.f32 %v834_v20 }
 0x25a   : > { %1885 = vtanh.f32 %v832_v22 }
 0x25b   : > { %1709 = vmatprep.mubr.msk.bf16.mxu1 %vm902_vm3, %v887_v23 }
 0x25c   : > { %1710 = vmatmul.mubr.msk.bf16.gmra.mrb[12].mxu1 %vm902_vm3, %v888_v21 }
 0x261   : > { %v1880_v24 = vpop.eup %1879 }
 0x262   : > { %v1882_v25 = vpop.eup %1881  ;;  %v865_v26 = vmul.f32 0.5, %v1880_v24 }
 0x263   : > { %v1884_v27 = vpop.eup %1883  ;;  %v863_v28 = vmul.f32 0.5, %v1882_v25 }
 0x264   : > { %v1886_v60 = vpop.eup %1885  ;;  %v866_v29 = vmul.f32 0.5, %v1884_v27  ;;  %v881_v31 = vadd.f32 0.5, %v865_v26 }
 0x265   : > { %v864_v30 = vmul.f32 0.5, %v1886_v60  ;;  %v879_v33 = vadd.f32 0.5, %v863_v28 }
 0x266   : > { %v882_v32 = vadd.f32 0.5, %v866_v29 }
 0x267   : > { %v880_v34 = vadd.f32 0.5, %v864_v30 }
 0x268   : > { %v890_v35 = vpack.c.bf16 %v882_v32, %v881_v31 }
 0x269   : > { %v889_v39 = vpack.c.bf16 %v880_v34, %v879_v33 }
 0x26b   : > { %1713 = vmatprep.mubr.msk.bf16.mxu1 %vm902_vm3, %v889_v39 }
 0x26c   : > { %1714 = vmatmul.mubr.msk.bf16.gmra.mrb[16].mxu1 %vm902_vm3, %v890_v35 }
 0x26d   : > { %1199 = vmatprep.mubr.bf16.mxu1 %v2020_v45 }
 0x30f   : > { %v1703_v50 = vpop.f32.mrb[4].mxu1 }
 0x310   : > { %v974_v51 = vadd.f32 %v1703_v50, %v2332_v49  ;;  %v965_v41 = vpop.f32.mrb[5].mxu1 }
 0x311   : > { %v966_v52 = vadd.f32 %v965_v41, %v2332_v49  ;;  %v1704_v53 = vpop.f32.mrb[6].mxu1 }
 0x312   : > { %v1030_v54 = vmul.f32 0.5, %v974_v51  ;;  %v977_v55 = vadd.f32 %v1704_v53, %v2332_v49  ;;  %v968_v56 = vpop.f32.mrb[7].mxu1 }
 0x313   : > { %v1028_v57 = vmul.f32 0.5, %v966_v52  ;;  %v969_v58 = vadd.f32 %v968_v56, %v2332_v49 }
 0x314   : > { %1887 = vtanh.f32 %v1030_v54  ;;  %v1031_v59 = vmul.f32 0.5, %v977_v55 }
 0x315   : > { %1889 = vtanh.f32 %v1028_v57  ;;  %v1029_v61 = vmul.f32 0.5, %v969_v58 }
 0x316   : > { %1891 = vtanh.f32 %v1031_v59 }
 0x317   : > { %1893 = vtanh.f32 %v1029_v61 }
 0x31e   : > { %v1888_v62 = vpop.eup %1887 }
 0x31f   : > { %v1890_v63 = vpop.eup %1889  ;;  %v1062_v0 = vmul.f32 0.5, %v1888_v62  ;;  %v1707_v1 = vpop.f32.mrb[8].mxu1 }
 0x320   : > { %v1892_v2 = vpop.eup %1891  ;;  %v1060_v3 = vmul.f32 0.5, %v1890_v63  ;;  %v990_v4 = vadd.f32 %v1707_v1, %v2332_v49  ;;  %v981_v5 = vpop.f32.mrb[9].mxu1 }
 0x321   : > { %v1894_v6 = vpop.eup %1893  ;;  %v1063_v7 = vmul.f32 0.5, %v1892_v2  ;;  %v982_v37 = vadd.f32 %v981_v5, %v2332_v49  ;;  %v1708_v38 = vpop.f32.mrb[10].mxu1  ;;  %v1078_v12 = vadd.f32 0.5, %v1062_v0 }
 0x322   : > { %v1061_v8 = vmul.f32 0.5, %v1894_v6  ;;  %v1034_v9 = vmul.f32 0.5, %v990_v4  ;;  %v993_v10 = vadd.f32 %v1708_v38, %v2332_v49  ;;  %v984_v11 = vpop.f32.mrb[11].mxu1  ;;  %v1076_v16 = vadd.f32 0.5, %v1060_v3 }
 0x323   : > { %v1079_v13 = vadd.f32 0.5, %v1063_v7  ;;  %v1032_v14 = vmul.f32 0.5, %v982_v37  ;;  %v985_v15 = vadd.f32 %v984_v11, %v2332_v49 }
 0x324   : > { %v1077_v17 = vadd.f32 0.5, %v1061_v8  ;;  %1895 = vtanh.f32 %v1034_v9  ;;  %v1035_v18 = vmul.f32 0.5, %v993_v10 }
 0x325   : > { %v1093_v19 = vpack.c.bf16 %v1079_v13, %v1078_v12  ;;  %1897 = vtanh.f32 %v1032_v14  ;;  %v1033_v20 = vmul.f32 0.5, %v985_v15 }
 0x326   : > { %v1092_v21 = vpack.c.bf16 %v1077_v17, %v1076_v16  ;;  %1899 = vtanh.f32 %v1035_v18 }
 0x327   : > { %1901 = vtanh.f32 %v1033_v20 }
 0x328   : > { %1546 = vmatmul.mubr.msk.bf16.vlgmr.msra.gmra.mrb[20].mxu1 %vm693_vm1, %v1092_v21 }
 0x329   : > { %1209 = vmatprep.mubr.bf16.mxu1 %v2020_v45 }
 0x32e   : > { %v1896_v22 = vpop.eup %1895 }
 0x32f   : > { %v1898_v23 = vpop.eup %1897  ;;  %v1066_v24 = vmul.f32 0.5, %v1896_v22  ;;  %v1711_v25 = vpop.f32.mrb[12].mxu1 }
 0x330   : > { %v1900_v26 = vpop.eup %1899  ;;  %v1064_v27 = vmul.f32 0.5, %v1898_v23  ;;  %v1006_v28 = vadd.f32 %v1711_v25, %v2332_v49  ;;  %v997_v60 = vpop.f32.mrb[13].mxu1  ;;  %1547 = vmatmul.mubr.msk.bf16.gmra.mrb[24].mxu1 %vm693_vm1, %v1093_v19 }
 0x331   : > { %v1902_v29 = vpop.eup %1901  ;;  %v1067_v30 = vmul.f32 0.5, %v1900_v26  ;;  %v998_v31 = vadd.f32 %v997_v60, %v2332_v49  ;;  %v1712_v32 = vpop.f32.mrb[14].mxu1  ;;  %1219 = vmatprep.mubr.bf16.mxu1 %v2020_v45  ;;  %v1082_v40 = vadd.f32 0.5, %v1066_v24  ;;  %v278_v26 = vld [vmem:[%s2481_s5] sm:$0xa]  ;;  %v1110_v60 = vsub.s32 7, %v2247_v36 }
 0x332   : > { %v1065_v33 = vmul.f32 0.5, %v1902_v29  ;;  %v1038_v34 = vmul.f32 0.5, %v1006_v28  ;;  %v1009_v35 = vadd.f32 %v1712_v32, %v2332_v49  ;;  %v1000_v39 = vpop.f32.mrb[15].mxu1  ;;  %v1080_v46 = vadd.f32 0.5, %v1064_v27 }
 0x333   : > { %v1083_v42 = vadd.f32 0.5, %v1067_v30  ;;  %v1036_v43 = vmul.f32 0.5, %v998_v31  ;;  %v1001_v44 = vadd.f32 %v1000_v39, %v2332_v49  ;;  %v279_v27 = vunpack.c.l.bf16 %v278_v26 }
 0x334   : > { %v1081_v47 = vadd.f32 0.5, %v1065_v33  ;;  %1903 = vtanh.f32 %v1038_v34  ;;  %v1039_v48 = vmul.f32 0.5, %v1009_v35  ;;  %v1106_v28 = vsub.s32 3, %v2247_v36 }
 0x335   : > { %v1095_v50 = vpack.c.bf16 %v1083_v42, %v1082_v40  ;;  %1905 = vtanh.f32 %v1036_v43  ;;  %v1037_v51 = vmul.f32 0.5, %v1001_v44  ;;  %v1111_v30 = vrot.slane %v279_v27, %v1110_v60 }
 0x336   : > { %v1094_v41 = vpack.c.bf16 %v1081_v47, %v1080_v46  ;;  %1907 = vtanh.f32 %v1039_v48  ;;  %v1107_v29 = vrot.slane %v279_v27, %v1106_v28 }
 0x337   : > { %1909 = vtanh.f32 %v1037_v51  ;;  %v2372_v32 = vrot.slane %v1111_v30, %v1106_v28 }
 0x338   : > { %1548 = vmatmul.mubr.msk.bf16.gmra.mrb[28].mxu1 %vm693_vm1, %v1094_v41  ;;  %v2370_v31 = vrot.slane %v1107_v29, %v1106_v28 }
 0x339   : > { %1229 = vmatprep.mubr.bf16.mxu1 %v2020_v45 }
 0x33e   : > { %v1904_v52 = vpop.eup %1903 }
 0x33f   : > { %v1906_v53 = vpop.eup %1905  ;;  %v1070_v54 = vmul.f32 0.5, %v1904_v52  ;;  %v1715_v55 = vpop.f32.mrb[16].mxu1 }
 0x340   : > { %v1908_v56 = vpop.eup %1907  ;;  %v1068_v57 = vmul.f32 0.5, %v1906_v53  ;;  %v1022_v58 = vadd.f32 %v1715_v55, %v2332_v49  ;;  %v1013_v59 = vpop.f32.mrb[17].mxu1  ;;  %1549 = vmatmul.mubr.msk.bf16.gmra.mrb[32].mxu1 %vm693_vm1, %v1095_v50 }
 0x341   : > { %v1910_v61 = vpop.eup %1909  ;;  %v1071_v62 = vmul.f32 0.5, %v1908_v56  ;;  %v1014_v63 = vadd.f32 %v1013_v59, %v2332_v49  ;;  %v1716_v0 = vpop.f32.mrb[18].mxu1  ;;  %1239 = vmatprep.mubr.bf16.mxu1 %v2020_v45  ;;  %v1086_v5 = vadd.f32 0.5, %v1070_v54 }
 0x342   : > { %v1069_v1 = vmul.f32 0.5, %v1910_v61  ;;  %v1042_v2 = vmul.f32 0.5, %v1022_v58  ;;  %v1025_v3 = vadd.f32 %v1716_v0, %v2332_v49  ;;  %v1016_v4 = vpop.f32.mrb[19].mxu1  ;;  %v1084_v38 = vadd.f32 0.5, %v1068_v57 }
 0x343   : > { %v1087_v6 = vadd.f32 0.5, %v1071_v62  ;;  %v1040_v7 = vmul.f32 0.5, %v1014_v63  ;;  %v1017_v37 = vadd.f32 %v1016_v4, %v2332_v49 }
 0x344   : > { %v1085_v8 = vadd.f32 0.5, %v1069_v1  ;;  %1911 = vtanh.f32 %v1042_v2  ;;  %v1043_v9 = vmul.f32 0.5, %v1025_v3 }
 0x345   : > { %v1097_v10 = vpack.c.bf16 %v1087_v6, %v1086_v5  ;;  %1913 = vtanh.f32 %v1040_v7  ;;  %v1041_v11 = vmul.f32 0.5, %v1017_v37 }
 0x346   : > { %v1096_v12 = vpack.c.bf16 %v1085_v8, %v1084_v38  ;;  %1915 = vtanh.f32 %v1043_v9 }
 0x347   : > { %1917 = vtanh.f32 %v1041_v11 }
 0x348   : > { %1550 = vmatmul.mubr.msk.bf16.gmra.mrb[36].mxu1 %vm693_vm1, %v1096_v12 }
 0x349   : > { %1249 = vmatprep.mubr.bf16.mxu1 %v2020_v45 }
 0x34e   : > { %v1912_v13 = vpop.eup %1911 }
 0x34f   : > { %v1914_v14 = vpop.eup %1913  ;;  %v1074_v15 = vmul.f32 0.5, %v1912_v13 }
 0x350   : > { %v1916_v16 = vpop.eup %1915  ;;  %v1072_v17 = vmul.f32 0.5, %v1914_v14  ;;  %1551 = vmatmul.mubr.msk.bf16.gmra.mrb[40].mxu1 %vm693_vm1, %v1097_v10 }
 0x351   : > { %v1918_v49 = vpop.eup %1917  ;;  %v1075_v18 = vmul.f32 0.5, %v1916_v16  ;;  %1259 = vmatprep.mubr.bf16.mxu1 %v2020_v45  ;;  %v1090_v20 = vadd.f32 0.5, %v1074_v15 }
 0x352   : > { %v1073_v19 = vmul.f32 0.5, %v1918_v49  ;;  %v1088_v22 = vadd.f32 0.5, %v1072_v17 }
 0x353   : > { %v1091_v21 = vadd.f32 0.5, %v1075_v18 }
 0x354   : > { %v1089_v23 = vadd.f32 0.5, %v1073_v19 }
 0x355   : > { %v1099_v24 = vpack.c.bf16 %v1091_v21, %v1090_v20 }
 0x356   : > { %v1098_v25 = vpack.c.bf16 %v1089_v23, %v1088_v22 }
 0x358   : > { %1552 = vmatmul.mubr.msk.bf16.gmra.mrb[44].mxu1 %vm693_vm1, %v1098_v25 }
 0x359   : > { %1269 = vmatprep.mubr.bf16.mxu1 %v2020_v45 }
 0x360   : > { %1553 = vmatmul.mubr.msk.bf16.gmra.mrb[48].mxu1 %vm693_vm1, %v1099_v24 }
 0x3fb   : > { %v1201_v33 = vpop.f32.mrb[20].mxu1 }
 0x3fc   : > { %v1202_v45 = vadd.f32 %v1201_v33, %v2370_v31  ;;  %v1203_v34 = vpop.f32.mrb[21].mxu1 }
 0x3fd   : > { %v1204_v35 = vadd.f32 %v1203_v34, %v2372_v32  ;;  %v1205_v39 = vpop.f32.mrb[22].mxu1 }
 0x3fe   : > { %v1206_v40 = vadd.f32 %v1205_v39, %v2370_v31  ;;  %v1207_v42 = vpop.f32.mrb[23].mxu1 }
 0x3ff   : > { %v1578_v43 = vpack.c.bf16 %v1204_v35, %v1202_v45  ;;  %v1208_v44 = vadd.f32 %v1207_v42, %v2372_v32 }
 0x401   : > { %1376 = vst [vmem:[%s2380_s18] sm:$0xff] %v1578_v43  ;;  %v1579_v36 = vpack.c.bf16 %v1208_v44, %v1206_v40 }
 0x403   : > { %1377 = vst [vmem:[%s2380_s18 + $0x8] sm:$0xff] %v1579_v36  ;;  %v1211_v46 = vpop.f32.mrb[24].mxu1 }
 0x404   : > { %v1212_v47 = vadd.f32 %v1211_v46, %v2370_v31  ;;  %v1213_v48 = vpop.f32.mrb[25].mxu1 }
 0x405   : > { %v1214_v50 = vadd.f32 %v1213_v48, %v2372_v32  ;;  %v1215_v51 = vpop.f32.mrb[26].mxu1 }
 0x406   : > { %v1216_v41 = vadd.f32 %v1215_v51, %v2370_v31  ;;  %v1217_v52 = vpop.f32.mrb[27].mxu1 }
 0x407   : > { %v1580_v53 = vpack.c.bf16 %v1214_v50, %v1212_v47  ;;  %v1218_v54 = vadd.f32 %v1217_v52, %v2372_v32 }
 0x409   : > { %1378 = vst [vmem:[%s2380_s18 + $0x10] sm:$0xff] %v1580_v53  ;;  %v1581_v55 = vpack.c.bf16 %v1218_v54, %v1216_v41 }
 0x40b   : > { %1379 = vst [vmem:[%s2380_s18 + $0x18] sm:$0xff] %v1581_v55  ;;  %v1221_v56 = vpop.f32.mrb[28].mxu1 }
 0x40c   : > { %v1222_v57 = vadd.f32 %v1221_v56, %v2370_v31  ;;  %v1223_v58 = vpop.f32.mrb[29].mxu1 }
 0x40d   : > { %v1224_v59 = vadd.f32 %v1223_v58, %v2372_v32  ;;  %v1225_v61 = vpop.f32.mrb[30].mxu1 }
 0x40e   : > { %v1226_v62 = vadd.f32 %v1225_v61, %v2370_v31  ;;  %v1227_v63 = vpop.f32.mrb[31].mxu1 }
 0x40f   : > { %v1582_v0 = vpack.c.bf16 %v1224_v59, %v1222_v57  ;;  %v1228_v1 = vadd.f32 %v1227_v63, %v2372_v32 }
 0x411   : > { %1380 = vst [vmem:[%s2380_s18 + $0x20] sm:$0xff] %v1582_v0  ;;  %v1583_v2 = vpack.c.bf16 %v1228_v1, %v1226_v62 }
 0x413   : > { %1381 = vst [vmem:[%s2380_s18 + $0x28] sm:$0xff] %v1583_v2  ;;  %v1231_v3 = vpop.f32.mrb[32].mxu1 }
 0x414   : > { %v1232_v4 = vadd.f32 %v1231_v3, %v2370_v31  ;;  %v1233_v5 = vpop.f32.mrb[33].mxu1 }
 0x415   : > { %v1234_v6 = vadd.f32 %v1233_v5, %v2372_v32  ;;  %v1235_v7 = vpop.f32.mrb[34].mxu1 }
 0x416   : > { %v1236_v37 = vadd.f32 %v1235_v7, %v2370_v31  ;;  %v1237_v38 = vpop.f32.mrb[35].mxu1 }
 0x417   : > { %v1584_v8 = vpack.c.bf16 %v1234_v6, %v1232_v4  ;;  %v1238_v9 = vadd.f32 %v1237_v38, %v2372_v32 }
 0x419   : > { %1382 = vst [vmem:[%s2380_s18 + $0x30] sm:$0xff] %v1584_v8  ;;  %v1585_v10 = vpack.c.bf16 %v1238_v9, %v1236_v37 }
 0x41b   : > { %1383 = vst [vmem:[%s2380_s18 + $0x38] sm:$0xff] %v1585_v10  ;;  %v1241_v11 = vpop.f32.mrb[36].mxu1 }
 0x41c   : > { %v1242_v12 = vadd.f32 %v1241_v11, %v2370_v31  ;;  %v1243_v13 = vpop.f32.mrb[37].mxu1 }
 0x41d   : > { %v1244_v14 = vadd.f32 %v1243_v13, %v2372_v32  ;;  %v1245_v15 = vpop.f32.mrb[38].mxu1 }
 0x41e   : > { %v1246_v16 = vadd.f32 %v1245_v15, %v2370_v31  ;;  %v1247_v17 = vpop.f32.mrb[39].mxu1 }
 0x41f   : > { %v1586_v49 = vpack.c.bf16 %v1244_v14, %v1242_v12  ;;  %v1248_v18 = vadd.f32 %v1247_v17, %v2372_v32 }
 0x421   : > { %1384 = vst [vmem:[%s2380_s18 + $0x40] sm:$0xff] %v1586_v49  ;;  %v1587_v19 = vpack.c.bf16 %v1248_v18, %v1246_v16 }
 0x423   : > { %1385 = vst [vmem:[%s2380_s18 + $0x48] sm:$0xff] %v1587_v19  ;;  %v1251_v20 = vpop.f32.mrb[40].mxu1 }
 0x424   : > { %v1252_v21 = vadd.f32 %v1251_v20, %v2370_v31  ;;  %v1253_v22 = vpop.f32.mrb[41].mxu1 }
 0x425   : > { %v1254_v23 = vadd.f32 %v1253_v22, %v2372_v32  ;;  %v1255_v24 = vpop.f32.mrb[42].mxu1 }
 0x426   : > { %v1256_v25 = vadd.f32 %v1255_v24, %v2370_v31  ;;  %v1257_v26 = vpop.f32.mrb[43].mxu1 }
 0x427   : > { %v1588_v27 = vpack.c.bf16 %v1254_v23, %v1252_v21  ;;  %v1258_v28 = vadd.f32 %v1257_v26, %v2372_v32 }
 0x429   : > { %1386 = vst [vmem:[%s2380_s18 + $0x50] sm:$0xff] %v1588_v27  ;;  %v1589_v60 = vpack.c.bf16 %v1258_v28, %v1256_v25 }
 0x42b   : > { %1387 = vst [vmem:[%s2380_s18 + $0x58] sm:$0xff] %v1589_v60  ;;  %v1261_v29 = vpop.f32.mrb[44].mxu1 }
 0x42c   : > { %v1262_v30 = vadd.f32 %v1261_v29, %v2370_v31  ;;  %v1263_v33 = vpop.f32.mrb[45].mxu1 }
 0x42d   : > { %v1264_v45 = vadd.f32 %v1263_v33, %v2372_v32  ;;  %v1265_v34 = vpop.f32.mrb[46].mxu1 }
 0x42e   : > { %v1266_v35 = vadd.f32 %v1265_v34, %v2370_v31  ;;  %v1267_v39 = vpop.f32.mrb[47].mxu1 }
 0x42f   : > { %v1590_v40 = vpack.c.bf16 %v1264_v45, %v1262_v30  ;;  %v1268_v42 = vadd.f32 %v1267_v39, %v2372_v32 }
 0x431   : > { %1388 = vst [vmem:[%s2380_s18 + $0x60] sm:$0xff] %v1590_v40  ;;  %v1591_v43 = vpack.c.bf16 %v1268_v42, %v1266_v35 }
 0x433   : > { %1389 = vst [vmem:[%s2380_s18 + $0x68] sm:$0xff] %v1591_v43  ;;  %v1271_v44 = vpop.f32.mrb[48].mxu1 }
 0x434   : > { %v1272_v36 = vadd.f32 %v1271_v44, %v2370_v31  ;;  %v1273_v46 = vpop.f32.mrb[49].mxu1 }
 0x435   : > { %v1274_v47 = vadd.f32 %v1273_v46, %v2372_v32  ;;  %v1275_v48 = vpop.f32.mrb[50].mxu1 }
 0x436   : > { %v1276_v50 = vadd.f32 %v1275_v48, %v2370_v31  ;;  %v1277_v51 = vpop.f32.mrb[51].mxu1 }
 0x437   : > { %v1592_v41 = vpack.c.bf16 %v1274_v47, %v1272_v36  ;;  %v1278_v52 = vadd.f32 %v1277_v51, %v2372_v32 }
 0x439   : > { %1390 = vst [vmem:[%s2380_s18 + $0x70] sm:$0xff] %v1592_v41  ;;  %v1593_v53 = vpack.c.bf16 %v1278_v52, %v1276_v50 }
 0x43b   : > { %1391 = vst [vmem:[%s2380_s18 + $0x78] sm:$0xff] %v1593_v53 }
 0x43c   : > { %1962 = shalt.err (!%p1959_p1)
}
 0x43d   : > { %s1963_s26 = scalar_lea.hbm %s2429_s11, 2048  ;;  %s1967_s16 = scalar_lea.hbm %s2482_s6, 8192 }
 0x43e   : > { %p1964_p3 = scmp.ne.s32.totalorder %s2429_s11, %s1963_s26  ;;  %p1968_p0 = scmp.lt.u32.totalorder %s2429_s11, %s2482_s6 }
 0x43f   : > { %p1969_p2 = scmp.lt.u32.totalorder %s1967_s16, %s1963_s26  ;;  %p1971_p6 = scmp.lt.u32.totalorder %s1963_s26, %s2429_s11 }
 0x440   : > { %p1965_p4 = pnand %p1964_p3, %p2489_p10 }
 0x441   : > { %p1970_p7 = por %p1969_p2, %p1968_p0 }
 0x442   : > { %p1966_p5 = pneg %p1965_p4 }
 0x443   : > { %p1972_p11 = por %p1971_p6, %p1970_p7 }
 0x445   : > { %p1973_p12 = pnand %p1972_p11, %p1966_p5 }
 0x447   : > { %1976 = shalt.err (!%p1973_p12)
}
 0x448   : > { %s2022_s19 = smov 128   ;;  %s2023_s20 = smov 8  }
 0x449   : > { %1726 = dma.vmem_to_hbm [thread:$0]  (%p2489_p10), %s2431_s13, 2048, %s2429_s11, %s1393_s25, %s2022_s19, %s2022_s19, %s2023_s20  }
 0x44a PF: > { %p1737_p8 = scmp.ge.s32.totalorder %s2015_s24, 2  ;;  %s1422_s14 = sand.u32 1, %s2003_s21  }
 0x44b   : > { %p2490_p9 = scmp.ne.s32.totalorder %s2487_s10, 0  ;;  %s1423_s15 = scalar_lea.sflag [#allocation4], %s1422_s14 }
 0x44d   : > { %p1733_p13 = pnand %p1737_p8, %p2490_p9 }
 0x44f   : > { %1998 = dma.done.wait (!%p1733_p13), %s1423_s15, 2048  }
 0x450   : > { %2000 = vsyncadd (!%p1733_p13), %s1423_s15, 4294965248  ;;  %p19_p1 = scmp.ge.s32.totalorder %s2084_s27, 6   ;;  %s2491_s21 = smov %s2007_s22 }
 0x451   : > { %s2492_s22 = smov %s2011_s23  ;;  %s2493_s23 = smov %s2096_s30 }
 0x452   : > { %s2494_s24 = smov %s2084_s27  ;;  %21 = sbr.rel (!%p19_p1) target bundleno = 5 (0x5), region = 89 }
 0x459   :  { %1428 = vsyncpa [#allocation3], 1 }
 0x45a   :  { %1430 = vsyncpa [#allocation3 + $0x1], 1 }
 0x45b   :  { %1431 = vsyncpa [#allocation4], 1 }
 0x45c   :  { %1433 = vsyncpa [#allocation4 + $0x1], 1 }

</bundles_post_ra>
